<compile_context>
chip_gen: v5e
topology: v5e:2x2
jax: 0.10.0
libtpu: 0.0.40
codegen_flags: <defaults>
</compile_context>

<pallas_src>
import functools

import jax
import jax.numpy as jnp
from jax.experimental import pallas as pl
from jax.experimental.pallas import tpu as pltpu


def _round_up(x, m):
    return ((x + m - 1) // m) * m


def _actor_kernel(s_ref, w1_ref, b1_ref, w2_ref, b2_ref, w3_ref, b3_ref,
                  a_ref, *, max_action):
    # MXU matmuls take bf16 operands with f32 accumulation; all elementwise
    # math (bias add, ReLU, tanh, scaling) stays in f32.
    s = s_ref[...].astype(jnp.bfloat16)                                  # [TB, S]

    h = jnp.dot(s, w1_ref[...], preferred_element_type=jnp.float32) + b1_ref[...]
    h = jnp.maximum(h, 0.0).astype(jnp.bfloat16)                         # [TB, H]

    h = jnp.dot(h, w2_ref[...], preferred_element_type=jnp.float32) + b2_ref[...]
    h = jnp.maximum(h, 0.0).astype(jnp.bfloat16)                         # [TB, H]

    out = jnp.dot(h, w3_ref[...], preferred_element_type=jnp.float32) + b3_ref[...]

    a_ref[...] = (max_action * jnp.tanh(out)).astype(a_ref.dtype)        # [TB, A_pad]


@functools.partial(jax.jit, static_argnames=("max_action", "block_b"))
def actor_forward(state, params, max_action, *, block_b=2048):
    """Equivalent of Actor.forward(state) -> action in [-max_action, max_action]."""
    w1, b1, w2, b2, w3, b3 = params
    B, state_dim = state.shape
    hidden = w1.shape[1]
    action_dim = w3.shape[1]

    assert block_b % 8 == 0, "block_b must be a multiple of 8"

    # bf16 weights for the MXU (no-op if already bf16); f32 biases for the VPU.
    w1 = w1.astype(jnp.bfloat16)
    w2 = w2.astype(jnp.bfloat16)
    w3 = w3.astype(jnp.bfloat16)
    b1 = b1.astype(jnp.float32)
    b2 = b2.astype(jnp.float32)
    b3 = b3.astype(jnp.float32)

    # Lane-dense output: pad layer 3 to a multiple of 128 output lanes so the
    # store path uses full-width unmasked vector stores. Sliced off below.
    out_pad = _round_up(action_dim, 128)
    if out_pad != action_dim:
        w3 = jnp.pad(w3, ((0, 0), (0, out_pad - action_dim)))
        b3 = jnp.pad(b3, ((0, 0), (0, out_pad - action_dim)))

    # Batch tiling:
    #  - small batches: one full-batch tile (a block equal to the full array dim
    #    is always legal regardless of the (8,128) rule);
    #  - large batches: at least two tiles (so both v7x TensorCores get work),
    #    each a multiple of 8 rows, capped at block_b.
    if B <= min(block_b, 1024):
        tb = B
    else:
        tb = min(block_b, _round_up(pl.cdiv(B, 2), 8))
    grid = (pl.cdiv(B, tb),)

    kernel = functools.partial(_actor_kernel, max_action=float(max_action))

    def resident(shape):
        # Full-array block with a constant index_map -> DMA'd once, stays in
        # VMEM for every grid step. Relies on all weights/biases being rank-2
        # (biases are stored as [1, out]) -- keep that invariant.
        return pl.BlockSpec(shape, lambda i: (0, 0))

    flops = 2 * B * (state_dim * hidden + hidden * hidden + hidden * out_pad)
    bytes_accessed = (
        4 * B * state_dim + 4 * B * out_pad                                 # state in / action out (f32)
        + 2 * (state_dim * hidden + hidden * hidden + hidden * out_pad)     # bf16 weights
        + 4 * (hidden + hidden + out_pad)                                   # f32 biases
    )
    cost = pl.CostEstimate(
        flops=flops,
        transcendentals=B * out_pad,          # tanh
        bytes_accessed=bytes_accessed,
    )

    out = pl.pallas_call(
        kernel,
        out_shape=jax.ShapeDtypeStruct((B, out_pad), state.dtype),
        grid=grid,
        in_specs=[
            pl.BlockSpec((tb, state_dim), lambda i: (i, 0)),   # state tile (pipelined)
            resident(w1.shape), resident(b1.shape),
            resident(w2.shape), resident(b2.shape),
            resident(w3.shape), resident(b3.shape),
        ],
        out_specs=pl.BlockSpec((tb, out_pad), lambda i: (i, 0)),
        compiler_params=pltpu.CompilerParams(
            dimension_semantics=("parallel",),     # shard batch tiles across TCs (v7x)
            vmem_limit_bytes=32 * 1024 * 1024,     # explicit budget, safe on v5e/v6e/v7x
        ),
        cost_estimate=cost,
    )(state, w1, b1, w2, b2, w3, b3)

    return out[:, :action_dim]


def init_actor_params(key, state_dim, action_dim, hidden=256):
    """Deterministic init mimicking nn.Linear: U(-1/sqrt(fan_in), 1/sqrt(fan_in)).

    Weights are stored transposed relative to PyTorch ([in, out]) and in bf16
    (MXU operand dtype). Biases are f32 with shape [1, out] for broadcasting.
    """
    dims = [
        (state_dim, hidden),   # l1
        (hidden, hidden),      # l2
        (hidden, action_dim),  # l3
    ]
    params = []
    keys = jax.random.split(key, 2 * len(dims))
    for i, (fan_in, fan_out) in enumerate(dims):
        bound = float(fan_in) ** -0.5
        w = jax.random.uniform(keys[2 * i], (fan_in, fan_out), jnp.float32, -bound, bound)
        b = jax.random.uniform(keys[2 * i + 1], (1, fan_out), jnp.float32, -bound, bound)
        params.append(w.astype(jnp.bfloat16))
        params.append(b)
    return tuple(params)


def _reference_forward(state, params, max_action):
    """Plain-JAX f32 reference (same bf16-stored weights, upcast) for checking."""
    w1, b1, w2, b2, w3, b3 = params
    w1, w2, w3 = (w.astype(jnp.float32) for w in (w1, w2, w3))
    h = jax.nn.relu(state @ w1 + b1)
    h = jax.nn.relu(h @ w2 + b2)
    return max_action * jnp.tanh(h @ w3 + b3)


if __name__ == "__main__":
    key = jax.random.PRNGKey(0)
    k_state, k_params, k_state2 = jax.random.split(key, 3)

    batch, state_dim, action_dim = 2, 16, 8
    max_action = 2.0

    state = jax.random.normal(k_state, (batch, state_dim), jnp.float32)
    params = init_actor_params(k_params, state_dim, action_dim)

    action = actor_forward(state, params, max_action)
    jax.block_until_ready(action)

    ref = _reference_forward(state, params, max_action)
    assert action.shape == (batch, action_dim)
    # bf16 MXU operands (f32 accumulation) -> loosened tolerance vs pure-f32.
    assert jnp.allclose(action, ref, atol=2e-2, rtol=2e-2)
    assert bool(jnp.all(jnp.abs(action) <= max_action + 1e-6))

    # Exercise the multi-tile pipelined path at a still-small shape (3 grid steps).
    state2 = jax.random.normal(k_state2, (24, state_dim), jnp.float32)
    action2 = actor_forward(state2, params, max_action, block_b=8)
    jax.block_until_ready(action2)
    ref2 = _reference_forward(state2, params, max_action)
    assert action2.shape == (24, action_dim)
    assert jnp.allclose(action2, ref2, atol=2e-2, rtol=2e-2)

    print("KERNEL_OK")
</pallas_src>

<mosaic_0001>
module attributes {stable_mosaic.version = 11 : i64} {
  func.func @_actor_kernel(%arg0: i32, %arg1: memref<2x16xf32, #tpu.memory_space<vmem>>, %arg2: memref<16x256xbf16, #tpu.memory_space<vmem>>, %arg3: memref<1x256xf32, #tpu.memory_space<vmem>>, %arg4: memref<256x256xbf16, #tpu.memory_space<vmem>>, %arg5: memref<1x256xf32, #tpu.memory_space<vmem>>, %arg6: memref<256x128xbf16, #tpu.memory_space<vmem>>, %arg7: memref<1x128xf32, #tpu.memory_space<vmem>>, %arg8: memref<2x128xf32, #tpu.memory_space<vmem>>) attributes {dimension_semantics = [#tpu.dimension_semantics<parallel>], iteration_bounds = array<i64: 1>, scalar_prefetch = 0 : i64, scratch_operands = 0 : i64, tpu.core_type = #tpu.core_type<tc>, window_params = [{transform_indices = @transform_0, window_bounds = array<i64: 2, 16>}, {pipeline_mode = #tpu.pipeline_mode<synchronous>, transform_indices = @transform_1, window_bounds = array<i64: 16, 256>}, {pipeline_mode = #tpu.pipeline_mode<synchronous>, transform_indices = @transform_2, window_bounds = array<i64: 1, 256>}, {pipeline_mode = #tpu.pipeline_mode<synchronous>, transform_indices = @transform_3, window_bounds = array<i64: 256, 256>}, {pipeline_mode = #tpu.pipeline_mode<synchronous>, transform_indices = @transform_4, window_bounds = array<i64: 1, 256>}, {pipeline_mode = #tpu.pipeline_mode<synchronous>, transform_indices = @transform_5, window_bounds = array<i64: 256, 128>}, {pipeline_mode = #tpu.pipeline_mode<synchronous>, transform_indices = @transform_6, window_bounds = array<i64: 1, 128>}, {transform_indices = @transform_7, window_bounds = array<i64: 2, 128>}]} {
    %c0 = arith.constant 0 : index
    %c0_0 = arith.constant 0 : index
    %0 = vector.load %arg1[%c0, %c0_0] : memref<2x16xf32, #tpu.memory_space<vmem>>, vector<2x16xf32>
    %1 = arith.truncf %0 : vector<2x16xf32> to vector<2x16xbf16>
    %c0_1 = arith.constant 0 : index
    %c0_2 = arith.constant 0 : index
    %2 = vector.load %arg2[%c0_1, %c0_2] : memref<16x256xbf16, #tpu.memory_space<vmem>>, vector<16x256xbf16>
    %cst = arith.constant dense<0.000000e+00> : vector<2x256xf32>
    %3 = tpu.matmul %1, %2, %cst {dimension_numbers = #tpu.dot_dimension_numbers<[1], [0], [0], [1], [0, 0, 1, 1], [], []>} : vector<2x16xbf16>, vector<16x256xbf16>, vector<2x256xf32> -> vector<2x256xf32>
    %c0_3 = arith.constant 0 : index
    %c0_4 = arith.constant 0 : index
    %4 = vector.load %arg3[%c0_3, %c0_4] : memref<1x256xf32, #tpu.memory_space<vmem>>, vector<1x256xf32>
    %5 = vector.broadcast %4 : vector<1x256xf32> to vector<2x256xf32>
    %6 = arith.addf %3, %5 : vector<2x256xf32>
    %cst_5 = arith.constant 0.000000e+00 : f32
    %7 = vector.broadcast %cst_5 : f32 to vector<2x256xf32>
    %8 = arith.maximumf %6, %7 : vector<2x256xf32>
    %9 = arith.truncf %8 : vector<2x256xf32> to vector<2x256xbf16>
    %c0_6 = arith.constant 0 : index
    %c0_7 = arith.constant 0 : index
    %10 = vector.load %arg4[%c0_6, %c0_7] : memref<256x256xbf16, #tpu.memory_space<vmem>>, vector<256x256xbf16>
    %cst_8 = arith.constant dense<0.000000e+00> : vector<2x256xf32>
    %11 = tpu.matmul %9, %10, %cst_8 {dimension_numbers = #tpu.dot_dimension_numbers<[1], [0], [0], [1], [0, 0, 1, 1], [], []>} : vector<2x256xbf16>, vector<256x256xbf16>, vector<2x256xf32> -> vector<2x256xf32>
    %c0_9 = arith.constant 0 : index
    %c0_10 = arith.constant 0 : index
    %12 = vector.load %arg5[%c0_9, %c0_10] : memref<1x256xf32, #tpu.memory_space<vmem>>, vector<1x256xf32>
    %13 = vector.broadcast %12 : vector<1x256xf32> to vector<2x256xf32>
    %14 = arith.addf %11, %13 : vector<2x256xf32>
    %cst_11 = arith.constant 0.000000e+00 : f32
    %15 = vector.broadcast %cst_11 : f32 to vector<2x256xf32>
    %16 = arith.maximumf %14, %15 : vector<2x256xf32>
    %17 = arith.truncf %16 : vector<2x256xf32> to vector<2x256xbf16>
    %c0_12 = arith.constant 0 : index
    %c0_13 = arith.constant 0 : index
    %18 = vector.load %arg6[%c0_12, %c0_13] : memref<256x128xbf16, #tpu.memory_space<vmem>>, vector<256x128xbf16>
    %cst_14 = arith.constant dense<0.000000e+00> : vector<2x128xf32>
    %19 = tpu.matmul %17, %18, %cst_14 {dimension_numbers = #tpu.dot_dimension_numbers<[1], [0], [0], [1], [0, 0, 1, 1], [], []>} : vector<2x256xbf16>, vector<256x128xbf16>, vector<2x128xf32> -> vector<2x128xf32>
    %c0_15 = arith.constant 0 : index
    %c0_16 = arith.constant 0 : index
    %20 = vector.load %arg7[%c0_15, %c0_16] : memref<1x128xf32, #tpu.memory_space<vmem>>, vector<1x128xf32>
    %21 = vector.broadcast %20 : vector<1x128xf32> to vector<2x128xf32>
    %22 = arith.addf %19, %21 : vector<2x128xf32>
    %23 = math.tanh %22 : vector<2x128xf32>
    %cst_17 = arith.constant 2.000000e+00 : f32
    %24 = vector.broadcast %cst_17 : f32 to vector<2x128xf32>
    %25 = arith.mulf %24, %23 : vector<2x128xf32>
    %c0_18 = arith.constant 0 : index
    %c0_19 = arith.constant 0 : index
    %26 = vector.load %arg8[%c0_18, %c0_19] : memref<2x128xf32, #tpu.memory_space<vmem>>, vector<2x128xf32>
    tpu.vector_store %arg8[%c0_18, %c0_19], %25 {strides = array<i32>} : memref<2x128xf32, #tpu.memory_space<vmem>>, vector<2x128xf32>,
    return
  }
  func.func @transform_0(%arg0: i32) -> (i32, i32) {
    %c0_i32 = arith.constant 0 : i32
    %c0_i32_0 = arith.constant 0 : i32
    return %arg0, %c0_i32 : i32, i32
  }
  func.func @transform_1(%arg0: i32) -> (i32, i32) {
    %c0_i32 = arith.constant 0 : i32
    %c0_i32_0 = arith.constant 0 : i32
    %c0_i32_1 = arith.constant 0 : i32
    return %c0_i32, %c0_i32_0 : i32, i32
  }
  func.func @transform_2(%arg0: i32) -> (i32, i32) {
    %c0_i32 = arith.constant 0 : i32
    %c0_i32_0 = arith.constant 0 : i32
    %c0_i32_1 = arith.constant 0 : i32
    return %c0_i32, %c0_i32_0 : i32, i32
  }
  func.func @transform_3(%arg0: i32) -> (i32, i32) {
    %c0_i32 = arith.constant 0 : i32
    %c0_i32_0 = arith.constant 0 : i32
    %c0_i32_1 = arith.constant 0 : i32
    return %c0_i32, %c0_i32_0 : i32, i32
  }
  func.func @transform_4(%arg0: i32) -> (i32, i32) {
    %c0_i32 = arith.constant 0 : i32
    %c0_i32_0 = arith.constant 0 : i32
    %c0_i32_1 = arith.constant 0 : i32
    return %c0_i32, %c0_i32_0 : i32, i32
  }
  func.func @transform_5(%arg0: i32) -> (i32, i32) {
    %c0_i32 = arith.constant 0 : i32
    %c0_i32_0 = arith.constant 0 : i32
    %c0_i32_1 = arith.constant 0 : i32
    return %c0_i32, %c0_i32_0 : i32, i32
  }
  func.func @transform_6(%arg0: i32) -> (i32, i32) {
    %c0_i32 = arith.constant 0 : i32
    %c0_i32_0 = arith.constant 0 : i32
    %c0_i32_1 = arith.constant 0 : i32
    return %c0_i32, %c0_i32_0 : i32, i32
  }
  func.func @transform_7(%arg0: i32) -> (i32, i32) {
    %c0_i32 = arith.constant 0 : i32
    %c0_i32_0 = arith.constant 0 : i32
    return %arg0, %c0_i32 : i32, i32
  }
}

</mosaic_0001>

<bundles_post_ra>
// kernel: actor_forward.1
= control target key start
LH: loop header
LB: loop body
LE: loop exit
PB: predicated region body
PF: predicated region fallthrough
CT: control target
= control target key end

     0   :  { %vm48_vm0 = vcmask 130048   ;;  %s1105_s0 = inlined_call_operand.vmem [shape: f32[2,16], index: 0, kind: input, shape index: {}]   ;;  %s1106_s1 = inlined_call_operand.vmem [shape: bf16[16,256], index: 1, kind: input, shape index: {}]   ;;  %s1107_s2 = inlined_call_operand.vmem [shape: f32[1,256], index: 2, kind: input, shape index: {}]   ;;  %s1108_s3 = inlined_call_operand.vmem [shape: bf16[256,256], index: 3, kind: input, shape index: {}]   ;;  %s1109_s4 = inlined_call_operand.vmem [shape: f32[1,256], index: 4, kind: input, shape index: {}]   ;;  %s1110_s5 = inlined_call_operand.vmem [shape: bf16[256,128], index: 5, kind: input, shape index: {}]   ;;  %s1111_s6 = inlined_call_operand.vmem [shape: f32[1,128], index: 6, kind: input, shape index: {}]   ;;  %s1112_s7 = inlined_call_operand.hbm [shape: f32[2,128], index: 7, kind: output, shape index: {}]  }
   0x1   :  { %v515_v0 = vld [vmem:[%s1106_s1] sm:$0xf]  ;;  %v716_v1 = vld [vmem:[%s1106_s1 + $0x4] sm:$0xf0]  ;;  %v715_v2 = vld [vmem:[%s1106_s1 + $0x4] sm:$0xf] }
   0x2   :  { %v516_v3 = vor.u32 %v716_v1, %v515_v0  ;;  %v517_v4 = vld [vmem:[%s1106_s1 + $0x8] sm:$0xf0]  ;;  %v28_v5 = vld [vmem:[%s1105_s0] sm:$0x3]  ;;  %v581_v8 = vld [vmem:[%s1108_s3 + $0x70] sm:$0xf] }
   0x3   :  { %v520_v6 = vor.u32 %v715_v2, %v517_v4  ;;  %v29_v7 = vpack.c.bf16 %v28_v5, %v28_v5  ;;  %v732_v9 = vld [vmem:[%s1108_s3 + $0x74] sm:$0xf0]  ;;  %v645_v10 = vld [vmem:[%s1108_s3 + $0xf0] sm:$0xf]  ;;  %v731_v13 = vld [vmem:[%s1108_s3 + $0x74] sm:$0xf] }
   0x4   :  { %59 = vmatpush.bf16.msra.mxu0 %v516_v3  ;;  %v582_v11 = vor.u32 %v732_v9, %v581_v8  ;;  %v748_v12 = vld [vmem:[%s1108_s3 + $0xf4] sm:$0xf0]  ;;  %v583_v14 = vld [vmem:[%s1108_s3 + $0x78] sm:$0xf0]  ;;  %v747_v17 = vld [vmem:[%s1108_s3 + $0xf4] sm:$0xf] }
   0x5   :  { %72 = vmatpush.bf16.msra.mxu1 %v520_v6  ;;  %v646_v15 = vor.u32 %v748_v12, %v645_v10  ;;  %v586_v16 = vor.u32 %v731_v13, %v583_v14  ;;  %v647_v18 = vld [vmem:[%s1108_s3 + $0xf8] sm:$0xf0]  ;;  %v573_v19 = vld [vmem:[%s1108_s3 + $0x60] sm:$0xf]  ;;  %v730_v21 = vld [vmem:[%s1108_s3 + $0x64] sm:$0xf0] }
   0x6   :  { %280 = vmatpush.bf16.msra.mxu2 %v582_v11  ;;  %v650_v20 = vor.u32 %v747_v17, %v647_v18  ;;  %v637_v22 = vld [vmem:[%s1108_s3 + $0xe0] sm:$0xf]  ;;  %v746_v23 = vld [vmem:[%s1108_s3 + $0xe4] sm:$0xf0]  ;;  %v574_v24 = vor.u32 %v730_v21, %v573_v19  ;;  %v729_v26 = vld [vmem:[%s1108_s3 + $0x64] sm:$0xf] }
   0x7   :  { %521 = vmatmul.msk.bf16.vlgmr.msra.gmra.mxu0 %vm48_vm0, %v29_v7  ;;  %293 = vmatpush.bf16.msra.mxu3 %v646_v15  ;;  %v638_v25 = vor.u32 %v746_v23, %v637_v22  ;;  %v575_v27 = vld [vmem:[%s1108_s3 + $0x68] sm:$0xf0]  ;;  %v745_v28 = vld [vmem:[%s1108_s3 + $0xe4] sm:$0xf]  ;;  %v565_v31 = vld [vmem:[%s1108_s3 + $0x50] sm:$0xf] }
   0x8   :  { %522 = vmatmul.msk.bf16.vlgmr.msra.gmra.mxu1 %vm48_vm0, %v29_v7  ;;  %306 = vmatpush.bf16.msrb.mxu0 %v586_v16  ;;  %v578_v29 = vor.u32 %v729_v26, %v575_v27  ;;  %v639_v30 = vld [vmem:[%s1108_s3 + $0xe8] sm:$0xf0]  ;;  %v728_v32 = vld [vmem:[%s1108_s3 + $0x54] sm:$0xf0]  ;;  %v629_v34 = vld [vmem:[%s1108_s3 + $0xd0] sm:$0xf] }
   0x9   :  { %319 = vmatpush.bf16.msrb.mxu1 %v650_v20  ;;  %v642_v33 = vor.u32 %v745_v28, %v639_v30  ;;  %v744_v35 = vld [vmem:[%s1108_s3 + $0xd4] sm:$0xf0]  ;;  %v727_v36 = vld [vmem:[%s1108_s3 + $0x54] sm:$0xf]  ;;  %v566_v37 = vor.u32 %v728_v32, %v565_v31  ;;  %v567_v38 = vld [vmem:[%s1108_s3 + $0x58] sm:$0xf0] }
   0xa   :  { %281 = vmatpush.bf16.msra.mxu2 %v574_v24  ;;  %v743_v39 = vld [vmem:[%s1108_s3 + $0xd4] sm:$0xf]  ;;  %v631_v40 = vld [vmem:[%s1108_s3 + $0xd8] sm:$0xf0]  ;;  %v630_v41 = vor.u32 %v744_v35, %v629_v34  ;;  %v557_v42 = vld [vmem:[%s1108_s3 + $0x40] sm:$0xf]  ;;  %v570_v44 = vor.u32 %v727_v36, %v567_v38 }
   0xb   :  { %294 = vmatpush.bf16.msra.mxu3 %v638_v25  ;;  %v726_v43 = vld [vmem:[%s1108_s3 + $0x44] sm:$0xf0]  ;;  %v621_v45 = vld [vmem:[%s1108_s3 + $0xc0] sm:$0xf]  ;;  %v634_v47 = vor.u32 %v743_v39, %v631_v40  ;;  %v725_v48 = vld [vmem:[%s1108_s3 + $0x44] sm:$0xf] }
   0xc   :  { %307 = vmatpush.bf16.msrb.mxu0 %v578_v29  ;;  %v742_v46 = vld [vmem:[%s1108_s3 + $0xc4] sm:$0xf0]  ;;  %v559_v49 = vld [vmem:[%s1108_s3 + $0x48] sm:$0xf0]  ;;  %v558_v50 = vor.u32 %v726_v43, %v557_v42  ;;  %v741_v51 = vld [vmem:[%s1108_s3 + $0xc4] sm:$0xf] }
   0xd   :  { %320 = vmatpush.bf16.msrb.mxu1 %v642_v33  ;;  %v623_v52 = vld [vmem:[%s1108_s3 + $0xc8] sm:$0xf0]  ;;  %v622_v53 = vor.u32 %v742_v46, %v621_v45  ;;  %v549_v54 = vld [vmem:[%s1108_s3 + $0x30] sm:$0xf]  ;;  %v724_v55 = vld [vmem:[%s1108_s3 + $0x34] sm:$0xf0]  ;;  %v562_v56 = vor.u32 %v725_v48, %v559_v49 }
   0xe   :  { %282 = vmatpush.bf16.msra.mxu2 %v566_v37  ;;  %v613_v57 = vld [vmem:[%s1108_s3 + $0xb0] sm:$0xf]  ;;  %v740_v58 = vld [vmem:[%s1108_s3 + $0xb4] sm:$0xf0]  ;;  %v626_v59 = vor.u32 %v741_v51, %v623_v52  ;;  %v723_v60 = vld [vmem:[%s1108_s3 + $0x34] sm:$0xf]  ;;  %v550_v62 = vor.u32 %v724_v55, %v549_v54 }
   0xf   :  { %295 = vmatpush.bf16.msra.mxu3 %v630_v41  ;;  %v551_v61 = vld [vmem:[%s1108_s3 + $0x38] sm:$0xf0]  ;;  %v739_v63 = vld [vmem:[%s1108_s3 + $0xb4] sm:$0xf]  ;;  %v541_v1 = vld [vmem:[%s1108_s3 + $0x20] sm:$0xf]  ;;  %v614_v2 = vor.u32 %v740_v58, %v613_v57 }
  0x10   :  { %308 = vmatpush.bf16.msrb.mxu0 %v570_v44  ;;  %v615_v0 = vld [vmem:[%s1108_s3 + $0xb8] sm:$0xf0]  ;;  %v722_v3 = vld [vmem:[%s1108_s3 + $0x24] sm:$0xf0] }
  0x11   :  { %321 = vmatpush.bf16.msrb.mxu1 %v634_v47 }
  0x12   :  { %283 = vmatpush.bf16.msra.mxu2 %v558_v50 }
  0x13   :  { %296 = vmatpush.bf16.msra.mxu3 %v622_v53 }
  0x14   :  { %12 = vsyncpa [#allocation3], 0  ;;  %309 = vmatpush.bf16.msrb.mxu0 %v562_v56  ;;  %v554_v4 = vor.u32 %v723_v60, %v551_v61  ;;  %v605_v5 = vld [vmem:[%s1108_s3 + $0xa0] sm:$0xf]  ;;  %v738_v6 = vld [vmem:[%s1108_s3 + $0xa4] sm:$0xf0]  ;;  %v618_v7 = vor.u32 %v739_v63, %v615_v0  ;;  %v542_v10 = vor.u32 %v722_v3, %v541_v1 }
  0x15   :  { %322 = vmatpush.bf16.msrb.mxu1 %v626_v59  ;;  %v721_v8 = vld [vmem:[%s1108_s3 + $0x24] sm:$0xf]  ;;  %v543_v9 = vld [vmem:[%s1108_s3 + $0x28] sm:$0xf0]  ;;  %v606_v13 = vor.u32 %v738_v6, %v605_v5  ;;  %v533_v16 = vld [vmem:[%s1108_s3 + $0x10] sm:$0xf] }
  0x16   :  { %284 = vmatpush.bf16.msra.mxu2 %v550_v62  ;;  %v737_v11 = vld [vmem:[%s1108_s3 + $0xa4] sm:$0xf]  ;;  %v607_v12 = vld [vmem:[%s1108_s3 + $0xa8] sm:$0xf0]  ;;  %v546_v14 = vor.u32 %v721_v8, %v543_v9  ;;  %v720_v17 = vld [vmem:[%s1108_s3 + $0x14] sm:$0xf0] }
  0x17   :  { %297 = vmatpush.bf16.msra.mxu3 %v614_v2  ;;  %v610_v15 = vor.u32 %v737_v11, %v607_v12  ;;  %v597_v18 = vld [vmem:[%s1108_s3 + $0x90] sm:$0xf]  ;;  %v534_v19 = vor.u32 %v720_v17, %v533_v16  ;;  %v736_v20 = vld [vmem:[%s1108_s3 + $0x94] sm:$0xf0]  ;;  %v719_v21 = vld [vmem:[%s1108_s3 + $0x14] sm:$0xf] }
  0x18   :  { %310 = vmatpush.bf16.msrb.mxu0 %v554_v4  ;;  %v535_v22 = vld [vmem:[%s1108_s3 + $0x18] sm:$0xf0]  ;;  %v598_v23 = vor.u32 %v736_v20, %v597_v18  ;;  %v735_v25 = vld [vmem:[%s1108_s3 + $0x94] sm:$0xf]  ;;  %v525_v28 = vld [vmem:[%s1108_s3] sm:$0xf] }
  0x19   :  { %323 = vmatpush.bf16.msrb.mxu1 %v618_v7  ;;  %v538_v24 = vor.u32 %v719_v21, %v535_v22  ;;  %v599_v26 = vld [vmem:[%s1108_s3 + $0x98] sm:$0xf0]  ;;  %v718_v29 = vld [vmem:[%s1108_s3 + $0x4] sm:$0xf0]  ;;  %v589_v30 = vld [vmem:[%s1108_s3 + $0x80] sm:$0xf] }
  0x1a   :  { %285 = vmatpush.bf16.msra.mxu2 %v542_v10  ;;  %v602_v27 = vor.u32 %v735_v25, %v599_v26  ;;  %v526_v31 = vor.u32 %v718_v29, %v525_v28  ;;  %v734_v32 = vld [vmem:[%s1108_s3 + $0x84] sm:$0xf0]  ;;  %v717_v33 = vld [vmem:[%s1108_s3 + $0x4] sm:$0xf]  ;;  %v527_v34 = vld [vmem:[%s1108_s3 + $0x8] sm:$0xf0] }
  0x1b   :  { %298 = vmatpush.bf16.msra.mxu3 %v606_v13  ;;  %v590_v35 = vor.u32 %v734_v32, %v589_v30  ;;  %v530_v36 = vor.u32 %v717_v33, %v527_v34  ;;  %v733_v37 = vld [vmem:[%s1108_s3 + $0x84] sm:$0xf]  ;;  %v591_v38 = vld [vmem:[%s1108_s3 + $0x88] sm:$0xf0]  ;;  %v764_v40 = vld [vmem:[%s1110_s5 + $0x78] sm:$0xff]  ;;  %s795_s20 = smov [#allocation2]  }
  0x1c   :  { %311 = vmatpush.bf16.msrb.mxu0 %v546_v14  ;;  %v594_v39 = vor.u32 %v733_v37, %v591_v38  ;;  %v756_v41 = vld [vmem:[%s1110_s5 + $0x38] sm:$0xff]  ;;  %v763_v42 = vld [vmem:[%s1110_s5 + $0x70] sm:$0xff]  ;;  %v762_v44 = vld [vmem:[%s1110_s5 + $0x68] sm:$0xff]  ;;  %s502_s21 = sshll.u32 %s795_s20, 4  ;;  %s504_s24 = sshll.u32 %s1112_s7, 4  ;;  %s503_s21 = int_to_ptr.vmem [resolvable:$true] %s502_s21  ;;  %s505_s24 = int_to_ptr.hbm [resolvable:$true] %s504_s24 }
  0x1d   :  { %324 = vmatpush.bf16.msrb.mxu1 %v610_v15  ;;  %v755_v43 = vld [vmem:[%s1110_s5 + $0x30] sm:$0xff]  ;;  %v754_v45 = vld [vmem:[%s1110_s5 + $0x28] sm:$0xff]  ;;  %v761_v46 = vld [vmem:[%s1110_s5 + $0x60] sm:$0xff] }
  0x1e   :  { %286 = vmatpush.bf16.msra.mxu2 %v534_v19  ;;  %v753_v47 = vld [vmem:[%s1110_s5 + $0x20] sm:$0xff]  ;;  %v760_v48 = vld [vmem:[%s1110_s5 + $0x58] sm:$0xff]  ;;  %v759_v50 = vld [vmem:[%s1110_s5 + $0x50] sm:$0xff] }
  0x1f   :  { %299 = vmatpush.bf16.msra.mxu3 %v598_v23  ;;  %v32_v49 = vld [vmem:[%s1107_s2] sm:$0x3]  ;;  %v752_v63 = vld [vmem:[%s1110_s5 + $0x18] sm:$0xff]  ;;  %v758_v0 = vld [vmem:[%s1110_s5 + $0x48] sm:$0xff] }
  0x20   :  { %312 = vmatpush.bf16.msrb.mxu0 %v538_v24  ;;  %v34_v51 = vperm.slane %v32_v49, 0  ;;  %v35_v52 = vperm.slane %v32_v49, 1  ;;  %v751_v1 = vld [vmem:[%s1110_s5 + $0x10] sm:$0xff]  ;;  %v757_v2 = vld [vmem:[%s1110_s5 + $0x40] sm:$0xff]  ;;  %v750_v3 = vld [vmem:[%s1110_s5 + $0x8] sm:$0xff] }
  0x21   :  { %325 = vmatpush.bf16.msrb.mxu1 %v602_v27  ;;  %v749_v4 = vld [vmem:[%s1110_s5] sm:$0xff] }
  0x22   :  { %287 = vmatpush.bf16.msra.mxu2 %v526_v31  ;;  %v114_v5 = vld [vmem:[%s1109_s4] sm:$0x3] }
  0x23   :  { %300 = vmatpush.bf16.msra.mxu3 %v590_v35  ;;  %v117_v6 = vperm.slane %v114_v5, 1  ;;  %v116_v11 = vperm.slane %v114_v5, 0  ;;  %v766_v25 = vld [vmem:[%s1111_s6] ss:$0 sm:$0xff] }
  0x24   :  { %313 = vmatpush.bf16.msrb.mxu0 %v530_v36 }
  0x25   :  { %326 = vmatpush.bf16.msrb.mxu1 %v594_v39 }
  0x26   :  { %468 = vmatpush.bf16.msrb.mxu2 %v756_v41 }
  0x27   :  { %481 = vmatpush.bf16.msrb.mxu3 %v764_v40 }
  0x2a   :  { %469 = vmatpush.bf16.msrb.mxu2 %v755_v43 }
  0x2b   :  { %482 = vmatpush.bf16.msrb.mxu3 %v763_v42 }
  0x2e   :  { %470 = vmatpush.bf16.msrb.mxu2 %v754_v45 }
  0x2f   :  { %483 = vmatpush.bf16.msrb.mxu3 %v762_v44 }
  0x32   :  { %471 = vmatpush.bf16.msrb.mxu2 %v753_v47 }
  0x33   :  { %484 = vmatpush.bf16.msrb.mxu3 %v761_v46 }
  0x36   :  { %472 = vmatpush.bf16.msrb.mxu2 %v752_v63 }
  0x37   :  { %485 = vmatpush.bf16.msrb.mxu3 %v760_v48 }
  0x3a   :  { %473 = vmatpush.bf16.msrb.mxu2 %v751_v1 }
  0x3b   :  { %486 = vmatpush.bf16.msrb.mxu3 %v759_v50 }
  0x3e   :  { %474 = vmatpush.bf16.msrb.mxu2 %v750_v3 }
  0x3f   :  { %487 = vmatpush.bf16.msrb.mxu3 %v758_v0 }
  0x42   :  { %475 = vmatpush.bf16.msrb.mxu2 %v749_v4 }
  0x43   :  { %488 = vmatpush.bf16.msrb.mxu3 %v757_v2 }
  0x84   :  { %v61_v53 = vpop.f32.mrf.mxu0 }
  0x85   :  { %v62_v54 = vadd.f32 %v61_v53, %v34_v51  ;;  %v74_v55 = vpop.f32.mrf.mxu1 }
  0x86   :  { %v75_v56 = vadd.f32 %v74_v55, %v35_v52 }
  0x87   :  { %v78_v57 = vmax.f32 %v62_v54, 0.0 }
  0x88   :  { %v79_v58 = vmax.f32 %v75_v56, 0.0 }
  0x89   :  { %v80_v59 = vpack.c.bf16 %v78_v57, %v78_v57 }
  0x8a   :  { %v81_v60 = vpack.c.bf16 %v79_v58, %v79_v58 }
  0x8b   :  { %288 = vmatmul.bf16.vlgmr.msra.gmra.mxu2 %v80_v59  ;;  %314 = vmatmul.bf16.vlgmr.msrb.gmra.mxu0 %v80_v59 }
  0x8c   :  { %301 = vmatmul.bf16.vlgmr.msra.gmra.mxu3 %v81_v60  ;;  %327 = vmatmul.bf16.vlgmr.msrb.gmra.mxu1 %v81_v60  ;;  %v63_v61 = vpop.f32.mrf.mxu0 }
  0x8d   :  { %v76_v62 = vpop.f32.mrf.mxu1 }
 0x108   :  { %v315_v7 = vpop.f32.mrf.mxu0 }
 0x109   :  { %v316_v8 = vadd.f32 %v315_v7, %v117_v6  ;;  %v328_v9 = vpop.f32.mrf.mxu1 }
 0x10b   :  { %v329_v10 = vadd.f32 %v328_v9, %v316_v8 }
 0x10d   :  { %v333_v12 = vmax.f32 %v329_v10, 0.0 }
 0x10e   :  { %v289_v13 = vpop.f32.mrf.mxu2 }
 0x10f   :  { %v335_v14 = vpack.c.bf16 %v333_v12, %v333_v12  ;;  %v290_v15 = vadd.f32 %v289_v13, %v116_v11  ;;  %v302_v16 = vpop.f32.mrf.mxu3 }
 0x110   :  { %v317_v17 = vpop.f32.mrf.mxu0 }
 0x111   :  { %v303_v18 = vadd.f32 %v302_v16, %v290_v15  ;;  %v330_v19 = vpop.f32.mrf.mxu1  ;;  %489 = vmatmul.bf16.vlgmr.msrb.gmra.mxu3 %v335_v14 }
 0x113   :  { %v332_v20 = vmax.f32 %v303_v18, 0.0 }
 0x115   :  { %v334_v21 = vpack.c.bf16 %v332_v20, %v332_v20 }
 0x116   :  { %v291_v22 = vpop.f32.mrf.mxu2 }
 0x117   :  { %v304_v23 = vpop.f32.mrf.mxu3  ;;  %476 = vmatmul.bf16.vlgmr.msrb.gmra.mxu2 %v334_v21 }
 0x194   :  { %v490_v24 = vpop.f32.mrf.mxu3 }
 0x19a   :  { %v477_v26 = vpop.f32.mrf.mxu2 }
 0x19b   :  { %v478_v27 = vadd.f32 %v766_v25, %v477_v26 }
 0x19c   :  { %v492_v28 = vpop.f32.mrf.mxu3 }
 0x19d   :  { %v491_v29 = vadd.f32 %v490_v24, %v478_v27 }
 0x19f   :  { %767 = vtanh.f32 %v491_v29 }
 0x1a2   :  { %v479_v30 = vpop.f32.mrf.mxu2 }
 0x1a5   :  { %v768_v31 = vpop.eup %767 }
 0x1a6   :  { %v495_v32 = vmul.f32 2.0, %v768_v31 }
 0x1a8   :  { %496 = vst [vmem:[#allocation2] sm:$0x3] %v495_v32 }
 0x1a9   :  { %507 = dma.vmem_to_hbm [thread:$0]  %s503_s21, 32, %s505_s24, [#allocation3]  }
 0x1aa   :  { %793 = dma.done.wait [#allocation3], 32  }
 0x1ab   :  { %794 = vsyncadd [#allocation3], 4294967264 }
 0x1ac   :  { %512 = vsyncpa [#allocation3], 1 }

</bundles_post_ra>
